<compile_context>
chip_gen: v7x
topology: tpu7x:2x2x1
jax: 0.10.0
libtpu: 0.0.40
codegen_flags: <defaults>
</compile_context>

<pallas_src>
import functools

import jax
import jax.numpy as jnp
from jax import lax
from jax.experimental import pallas as pl
from jax.experimental.pallas import tpu as pltpu


def _round_up(v, m):
    return (v + m - 1) // m * m


def _rel_coord_kernel(x_ref, packed_ref, posw_ref, *, valid_size, width):
    # Block shapes: x_ref (B, C, S_pad), packed_ref (B, 8, S_pad),
    #               posw_ref (B, S_sub, S_pad).
    B, C, S_pad = x_ref.shape
    S_sub = posw_ref.shape[1]
    S = valid_size
    inv_c = jnp.float32(1.0 / C)
    inv_s = jnp.float32(1.0 / S)
    size_f = jnp.float32(width)
    big = jnp.float32(S_pad)

    # ---- loop-invariant index math, hoisted (JAX does not CSE iota/broadcast).
    kk = lax.broadcasted_iota(jnp.int32, (1, S_pad), 1).astype(jnp.float32)
    # floor((k + 0.5) / W) == k // W exactly, even if the divide is 1-2 ulp off.
    i_k = jnp.floor((kk + 0.5) / size_f)
    j_k = kk - i_k * size_f
    lane_valid = (kk < jnp.float32(S)) if S_pad != S else None
    row = lax.broadcasted_iota(jnp.int32, (8, S_pad), 0)
    row_eq = tuple(row == r for r in range(6))

    def process(b):
        x = x_ref[b]                                        # (C, S_pad)

        # ---- channel sum once; mean = sum * (1/C); threshold = sum / S ------
        sum_row = jnp.sum(x, axis=0, keepdims=True)         # (1, S_pad)
        thr = jnp.sum(sum_row) * inv_s                      # padded lanes are 0
        binary = (sum_row > thr).astype(jnp.float32)        # (1, S_pad)
        if lane_valid is not None:
            binary = jnp.where(lane_valid, binary, 0.0)     # kill padded lanes
        pw_row = sum_row * inv_c * binary                   # (1, S_pad) pos. wts

        # ---- position_weight = pw ⊗ pw (VPU outer product); the column vector
        #      comes from a tiny in-kernel lane->sublane transpose ------------
        pw_col = jnp.transpose(pw_row)                      # (S_pad, 1)
        if S_sub != S_pad:
            pw_col = pw_col[:S_sub]                         # 8-aligned truncate
        posw_ref[b] = pw_col * pw_row                       # (S_sub, S_pad)

        # ---- argmax over valid spatial positions -> anchor (i, j) -----------
        pw_am = pw_row if lane_valid is None else jnp.where(
            lane_valid, pw_row, -jnp.inf)
        max_val = jnp.max(pw_am)
        idx_f = jnp.min(jnp.where(pw_am == max_val, kk, big))   # first max
        is_anchor = kk == idx_f
        anchor_i = jnp.min(jnp.where(is_anchor, i_k, big))
        anchor_j = jnp.min(jnp.where(is_anchor, j_k, big))

        # ---- relative coordinates / masked distance -------------------------
        ci = (i_k - anchor_i) / size_f                      # (1, S_pad)
        cj = (j_k - anchor_j) / size_f                      # (1, S_pad)
        dist = jnp.sqrt(ci * ci + cj * cj) * binary         # (1, S_pad)

        # ---- pack all small per-pixel outputs + the anchor pair into one
        #      sublane-dense (8, S_pad) tile: one store / one output DMA.
        #      (Select chain touches only 2 vregs; masks are hoisted above.
        #       Chosen over a sublane concat to avoid relying on unaligned
        #       concat lowering -- cost is negligible either way.) ------------
        packed = jnp.where(row_eq[0], dist, jnp.float32(0.0))
        packed = jnp.where(row_eq[1], ci, packed)
        packed = jnp.where(row_eq[2], cj, packed)
        packed = jnp.where(row_eq[3], binary, packed)
        packed = jnp.where(row_eq[4], anchor_i, packed)     # broadcast scalar
        packed = jnp.where(row_eq[5], anchor_j, packed)     # broadcast scalar
        packed_ref[b] = packed                              # rows 6,7 = padding

    if B == 1:
        process(0)
    else:
        # fori_loop (not a static Python unroll) bounds live ranges as b_tile
        # grows; refs support dynamic first-axis indexing.
        def body(b, carry):
            process(b)
            return carry
        lax.fori_loop(0, B, body, 0)


def _vmem_capacity_bytes():
    """Physical per-core VMEM, queried at trace time (conservative fallback)."""
    try:
        info = pltpu.get_tpu_info()
        for attr in ("vmem_capacity_bytes", "vmem_bytes"):
            cap = getattr(info, attr, None)
            if cap:
                return int(cap)
    except Exception:
        pass
    return 64 << 20          # v7x-sized fallback (smallest of v5e/v6e/v7x)


def _pick_b_tile(N, per_b_bytes, budget_bytes, multi_tc):
    """Largest divisor of N whose double-buffered blocks fit the budget.

    On 2-TC parts (v7x-like) keep >= 2 grid steps (megacore sharding) and
    prefer an even step count; single-TC parts (v5e/v6e) may collapse to one
    big block to amortize the ~0.35 us per-step overhead."""
    candidates = []
    for b in range(1, N + 1):
        if N % b:
            continue
        if 2 * b * per_b_bytes > budget_bytes:
            break
        if multi_tc and N >= 2 and (N // b) < 2:
            continue
        candidates.append(b)
    if not candidates:
        return 1
    if multi_tc:
        even = [b for b in candidates if (N // b) % 2 == 0]
        if even:
            return max(even)
    return max(candidates)


def relative_coord_predictor(x, b_tile=None):
    """x: (N, C, H, W) float32.

    Returns (relative_coord_total (N, H*W, 2), basic_anchor (N, 2),
             position_weight (N, H*W, H*W)) -- same semantics as the PyTorch
             RelativeCoordPredictor.forward.
    """
    N, C, H, W = x.shape
    assert H == W, "module assumes a square spatial map (size = H)"
    S = H * W
    assert S < (1 << 24), "float index decode requires S < 2**24"
    S_pad = _round_up(S, 128)        # lane-dense stores / DMAs
    S_sub = _round_up(S, 8)          # sublane-aligned position-weight rows

    x_cs = x.reshape(N, C, S)        # single input view; no transposed copy
    if S_pad != S:
        x_cs = jnp.pad(x_cs, ((0, 0), (0, 0), (0, S_pad - S)))

    vmem_cap = _vmem_capacity_bytes()
    multi_tc = vmem_cap <= (64 << 20)        # v7x-like: 2 TCs share the grid
    scoped_cap = int(vmem_cap * 0.8)         # never request 100% of physical

    per_b_bytes = 4 * (C * S_pad + 8 * S_pad + S_sub * S_pad)
    if b_tile is None:
        b_tile = _pick_b_tile(N, per_b_bytes,
                              max(scoped_cap - (8 << 20), 16 << 20), multi_tc)
    assert N % b_tile == 0, "b_tile must divide the batch size"

    out_shape = (
        jax.ShapeDtypeStruct((N, 8, S_pad), jnp.float32),      # packed smalls
        jax.ShapeDtypeStruct((N, S_sub, S_pad), jnp.float32),  # position weight
    )

    grid_spec = pltpu.PrefetchScalarGridSpec(
        num_scalar_prefetch=0,
        grid=(N // b_tile,),
        in_specs=[pl.BlockSpec((b_tile, C, S_pad), lambda n: (n, 0, 0))],
        out_specs=[
            pl.BlockSpec((b_tile, 8, S_pad), lambda n: (n, 0, 0)),
            pl.BlockSpec((b_tile, S_sub, S_pad), lambda n: (n, 0, 0)),
        ],
    )

    # Double-buffered blocks + headroom, capped safely below physical VMEM.
    vmem_limit = int(min(max(2 * b_tile * per_b_bytes + (8 << 20), 32 << 20),
                         scoped_cap))

    cost = pl.CostEstimate(
        flops=int(N) * (C * S_pad + 3 * S_sub * S_pad),
        transcendentals=int(N) * S_pad,
        bytes_accessed=4 * int(N) * (C * S_pad + 8 * S_pad + S_sub * S_pad),
    )

    kernel = functools.partial(_rel_coord_kernel, valid_size=S, width=W)
    packed, posw_pad = pl.pallas_call(
        kernel,
        out_shape=out_shape,
        grid_spec=grid_spec,
        compiler_params=pltpu.CompilerParams(
            dimension_semantics=("parallel",),
            vmem_limit_bytes=vmem_limit,
        ),
        cost_estimate=cost,
    )(x_cs)

    dist = packed[:, 0, :S]
    ci = packed[:, 1, :S]
    cj = packed[:, 2, :S]
    binary = packed[:, 3, :S]
    basic_anchor = packed[:, 4:6, 0]                 # (N, 2) = (i, j)
    posw = posw_pad[:, :S, :S]

    # atan2 glue (see TODO(synk)): matches torch.atan2(coord[...,1], coord[...,0])
    relative_angle = (jnp.arctan2(cj, ci) / jnp.pi + 1.0) / 2.0
    relative_angle = relative_angle * binary

    relative_coord_total = jnp.stack([dist, relative_angle], axis=-1)
    return relative_coord_total, basic_anchor, posw


def _reference(x):
    # Pure-JAX transcription of the PyTorch forward (correctness oracle).
    N, C, H, W = x.shape
    S = H * W
    mask = jnp.sum(x, axis=1).reshape(N, S)
    thr = jnp.mean(mask, axis=1, keepdims=True)
    binary = (mask > thr).astype(jnp.float32)
    masked = x.reshape(N, C, S) * binary[:, None, :]
    pw = jnp.mean(masked, axis=1)                               # (N, S)
    idx = jnp.argmax(pw, axis=1)                                # (N,)
    ii = jnp.arange(S) // W
    jj = jnp.arange(S) % W
    label = jnp.stack([ii, jj], axis=-1).astype(jnp.float32)    # (S, 2)
    anchor = label[idx]                                         # (N, 2)
    rel = (label[None, :, :] - anchor[:, None, :]) / H
    dist = jnp.sqrt(jnp.sum(rel ** 2, axis=-1)) * binary
    ang = ((jnp.arctan2(rel[..., 1], rel[..., 0]) / jnp.pi + 1.0) / 2.0) * binary
    rct = jnp.stack([dist, ang], axis=-1)
    posw = pw[:, :, None] * pw[:, None, :]
    return rct, anchor, posw


def _check(x, b_tile):
    rct_r, anchor_r, posw_r = _reference(x)
    fn = jax.jit(functools.partial(relative_coord_predictor, b_tile=b_tile))
    rct, anchor, posw = fn(x)
    jax.block_until_ready((rct, anchor, posw))
    N, _, H, W = x.shape
    assert rct.shape == (N, H * W, 2)
    assert anchor.shape == (N, 2)
    assert posw.shape == (N, H * W, H * W)
    assert jnp.allclose(rct, rct_r, atol=1e-4, rtol=1e-4)
    assert jnp.allclose(anchor, anchor_r, atol=1e-4, rtol=1e-4)
    assert jnp.allclose(posw, posw_r, atol=1e-4, rtol=1e-4)


if __name__ == "__main__":
    k0, k1 = jax.random.split(jax.random.PRNGKey(0))

    # Primary shape: 16x16 spatial map (S = 256, already lane/sublane aligned).
    x_aligned = jax.random.normal(k0, (2, 4, 16, 16), dtype=jnp.float32)
    for bt in (1, 2, None):          # static path, fori_loop path, auto picker
        _check(x_aligned, bt)

    # Realistic ResNet-style 14x14 map (S = 196): exercises the lane-padded
    # (S_pad = 256) and sublane-padded (S_sub = 200) output path.
    x_padded = jax.random.normal(k1, (2, 4, 14, 14), dtype=jnp.float32)
    for bt in (1, 2):
        _check(x_padded, bt)

    print("KERNEL_OK")
</pallas_src>

<mosaic_0001>
module attributes {stable_mosaic.version = 11 : i64} {
  func.func @_rel_coord_kernel(%arg0: i32, %arg1: memref<1x4x256xf32, #tpu.memory_space<vmem>>, %arg2: memref<1x8x256xf32, #tpu.memory_space<vmem>>, %arg3: memref<1x256x256xf32, #tpu.memory_space<vmem>>) attributes {dimension_semantics = [#tpu.dimension_semantics<parallel>], iteration_bounds = array<i64: 2>, scalar_prefetch = 0 : i64, scratch_operands = 0 : i64, tpu.core_type = #tpu.core_type<tc>, window_params = [{transform_indices = @transform_0, window_bounds = array<i64: 1, 4, 256>}, {transform_indices = @transform_1, window_bounds = array<i64: 1, 8, 256>}, {transform_indices = @transform_2, window_bounds = array<i64: 1, 256, 256>}]} {
    %0 = tpu.iota {dimensions = array<i32: 1>} : vector<1x256xi32>
    %1 = arith.sitofp %0 : vector<1x256xi32> to vector<1x256xf32>
    %cst = arith.constant 5.000000e-01 : f32
    %2 = vector.broadcast %cst : f32 to vector<1x256xf32>
    %3 = arith.addf %1, %2 : vector<1x256xf32>
    %cst_0 = arith.constant 1.600000e+01 : f32
    %4 = vector.broadcast %cst_0 : f32 to vector<1x256xf32>
    %5 = arith.divf %3, %4 : vector<1x256xf32>
    %6 = math.floor %5 : vector<1x256xf32>
    %cst_1 = arith.constant 1.600000e+01 : f32
    %7 = vector.broadcast %cst_1 : f32 to vector<1x256xf32>
    %8 = arith.mulf %6, %7 : vector<1x256xf32>
    %9 = arith.subf %1, %8 : vector<1x256xf32>
    %10 = tpu.iota {dimensions = array<i32: 0>} : vector<8x256xi32>
    %c0_i32 = arith.constant 0 : i32
    %11 = vector.broadcast %c0_i32 : i32 to vector<8x256xi32>
    %12 = arith.cmpi eq, %10, %11 : vector<8x256xi32>
    %c1_i32 = arith.constant 1 : i32
    %13 = vector.broadcast %c1_i32 : i32 to vector<8x256xi32>
    %14 = arith.cmpi eq, %10, %13 : vector<8x256xi32>
    %c2_i32 = arith.constant 2 : i32
    %15 = vector.broadcast %c2_i32 : i32 to vector<8x256xi32>
    %16 = arith.cmpi eq, %10, %15 : vector<8x256xi32>
    %c3_i32 = arith.constant 3 : i32
    %17 = vector.broadcast %c3_i32 : i32 to vector<8x256xi32>
    %18 = arith.cmpi eq, %10, %17 : vector<8x256xi32>
    %c4_i32 = arith.constant 4 : i32
    %19 = vector.broadcast %c4_i32 : i32 to vector<8x256xi32>
    %20 = arith.cmpi eq, %10, %19 : vector<8x256xi32>
    %c5_i32 = arith.constant 5 : i32
    %21 = vector.broadcast %c5_i32 : i32 to vector<8x256xi32>
    %22 = arith.cmpi eq, %10, %21 : vector<8x256xi32>
    %c0 = arith.constant 0 : index
    %c0_2 = arith.constant 0 : index
    %c0_3 = arith.constant 0 : index
    %23 = vector.load %arg1[%c0, %c0_2, %c0_3] : memref<1x4x256xf32, #tpu.memory_space<vmem>>, vector<1x4x256xf32>
    %24 = vector.shape_cast %23 : vector<1x4x256xf32> to vector<4x256xf32>
    %cst_4 = arith.constant dense<0.000000e+00> : vector<256xf32>
    %25 = vector.multi_reduction <add>, %24, %cst_4 [0] : vector<4x256xf32> to vector<256xf32>
    %26 = vector.shape_cast %25 : vector<256xf32> to vector<1x256xf32>
    %27 = vector.shape_cast %26 : vector<1x256xf32> to vector<1x1x256xf32>
    %cst_5 = arith.constant dense<0.000000e+00> : vector<1xf32>
    %28 = vector.multi_reduction <add>, %27, %cst_5 [1, 2] : vector<1x1x256xf32> to vector<1xf32>
    %29 = vector.shape_cast %28 : vector<1xf32> to vector<1x1x1xf32>
    %30 = vector.extract %29[0, 0, 0] : f32 from vector<1x1x1xf32>
    %cst_6 = arith.constant 3.906250e-03 : f32
    %31 = arith.mulf %30, %cst_6 : f32
    %32 = vector.broadcast %31 : f32 to vector<1x256xf32>
    %33 = arith.cmpf ogt, %26, %32 : vector<1x256xf32>
    %34 = arith.extui %33 : vector<1x256xi1> to vector<1x256xi32>
    %35 = arith.sitofp %34 : vector<1x256xi32> to vector<1x256xf32>
    %cst_7 = arith.constant 2.500000e-01 : f32
    %36 = vector.broadcast %cst_7 : f32 to vector<1x256xf32>
    %37 = arith.mulf %26, %36 : vector<1x256xf32>
    %38 = arith.mulf %37, %35 : vector<1x256xf32>
    %39 = tpu.transpose %38, [1, 0] : vector<1x256xf32> -> vector<256x1xf32>
    %40 = vector.broadcast %39 : vector<256x1xf32> to vector<256x256xf32>
    %41 = vector.broadcast %38 : vector<1x256xf32> to vector<256x256xf32>
    %42 = arith.mulf %40, %41 : vector<256x256xf32>
    %c0_8 = arith.constant 0 : index
    %c0_9 = arith.constant 0 : index
    %c0_10 = arith.constant 0 : index
    %43 = vector.load %arg3[%c0_8, %c0_9, %c0_10] : memref<1x256x256xf32, #tpu.memory_space<vmem>>, vector<1x256x256xf32>
    %44 = vector.shape_cast %43 : vector<1x256x256xf32> to vector<256x256xf32>
    %45 = vector.shape_cast %42 : vector<256x256xf32> to vector<1x256x256xf32>
    tpu.vector_store %arg3[%c0_8, %c0_9, %c0_10], %45 {strides = array<i32>} : memref<1x256x256xf32, #tpu.memory_space<vmem>>, vector<1x256x256xf32>,
    %46 = vector.shape_cast %38 : vector<1x256xf32> to vector<1x1x256xf32>
    %cst_11 = arith.constant dense<0xFF800000> : vector<1xf32>
    %47 = vector.multi_reduction <maximumf>, %46, %cst_11 [1, 2] : vector<1x1x256xf32> to vector<1xf32>
    %48 = vector.shape_cast %47 : vector<1xf32> to vector<1x1x1xf32>
    %49 = vector.extract %48[0, 0, 0] : f32 from vector<1x1x1xf32>
    %50 = vector.broadcast %49 : f32 to vector<1x256xf32>
    %51 = arith.cmpf oeq, %38, %50 : vector<1x256xf32>
    %cst_12 = arith.constant 2.560000e+02 : f32
    %52 = vector.broadcast %cst_12 : f32 to vector<1x256xf32>
    %53 = arith.select %51, %1, %52 : vector<1x256xi1>, vector<1x256xf32>
    %54 = vector.shape_cast %53 : vector<1x256xf32> to vector<1x1x256xf32>
    %cst_13 = arith.constant dense<0x7F800000> : vector<1xf32>
    %55 = vector.multi_reduction <minimumf>, %54, %cst_13 [1, 2] : vector<1x1x256xf32> to vector<1xf32>
    %56 = vector.shape_cast %55 : vector<1xf32> to vector<1x1x1xf32>
    %57 = vector.extract %56[0, 0, 0] : f32 from vector<1x1x1xf32>
    %58 = vector.broadcast %57 : f32 to vector<1x256xf32>
    %59 = arith.cmpf oeq, %1, %58 : vector<1x256xf32>
    %cst_14 = arith.constant 2.560000e+02 : f32
    %60 = vector.broadcast %cst_14 : f32 to vector<1x256xf32>
    %61 = arith.select %59, %6, %60 : vector<1x256xi1>, vector<1x256xf32>
    %62 = vector.shape_cast %61 : vector<1x256xf32> to vector<1x1x256xf32>
    %cst_15 = arith.constant dense<0x7F800000> : vector<1xf32>
    %63 = vector.multi_reduction <minimumf>, %62, %cst_15 [1, 2] : vector<1x1x256xf32> to vector<1xf32>
    %64 = vector.shape_cast %63 : vector<1xf32> to vector<1x1x1xf32>
    %65 = vector.extract %64[0, 0, 0] : f32 from vector<1x1x1xf32>
    %cst_16 = arith.constant 2.560000e+02 : f32
    %66 = vector.broadcast %cst_16 : f32 to vector<1x256xf32>
    %67 = arith.select %59, %9, %66 : vector<1x256xi1>, vector<1x256xf32>
    %68 = vector.shape_cast %67 : vector<1x256xf32> to vector<1x1x256xf32>
    %cst_17 = arith.constant dense<0x7F800000> : vector<1xf32>
    %69 = vector.multi_reduction <minimumf>, %68, %cst_17 [1, 2] : vector<1x1x256xf32> to vector<1xf32>
    %70 = vector.shape_cast %69 : vector<1xf32> to vector<1x1x1xf32>
    %71 = vector.extract %70[0, 0, 0] : f32 from vector<1x1x1xf32>
    %72 = vector.broadcast %65 : f32 to vector<1x256xf32>
    %73 = arith.subf %6, %72 : vector<1x256xf32>
    %cst_18 = arith.constant 1.600000e+01 : f32
    %74 = vector.broadcast %cst_18 : f32 to vector<1x256xf32>
    %75 = arith.divf %73, %74 : vector<1x256xf32>
    %76 = vector.broadcast %71 : f32 to vector<1x256xf32>
    %77 = arith.subf %9, %76 : vector<1x256xf32>
    %cst_19 = arith.constant 1.600000e+01 : f32
    %78 = vector.broadcast %cst_19 : f32 to vector<1x256xf32>
    %79 = arith.divf %77, %78 : vector<1x256xf32>
    %80 = arith.mulf %75, %75 : vector<1x256xf32>
    %81 = arith.mulf %79, %79 : vector<1x256xf32>
    %82 = arith.addf %80, %81 : vector<1x256xf32>
    %83 = math.sqrt %82 : vector<1x256xf32>
    %84 = arith.mulf %83, %35 : vector<1x256xf32>
    %cst_20 = arith.constant 0.000000e+00 : f32
    %85 = vector.shape_cast %84 : vector<1x256xf32> to vector<1x256xf32>
    %86 = vector.broadcast %85 : vector<1x256xf32> to vector<8x256xf32>
    %87 = vector.broadcast %cst_20 : f32 to vector<8x256xf32>
    %88 = arith.select %12, %86, %87 : vector<8x256xi1>, vector<8x256xf32>
    %89 = vector.shape_cast %75 : vector<1x256xf32> to vector<1x256xf32>
    %90 = vector.broadcast %89 : vector<1x256xf32> to vector<8x256xf32>
    %91 = arith.select %14, %90, %88 : vector<8x256xi1>, vector<8x256xf32>
    %92 = vector.shape_cast %79 : vector<1x256xf32> to vector<1x256xf32>
    %93 = vector.broadcast %92 : vector<1x256xf32> to vector<8x256xf32>
    %94 = arith.select %16, %93, %91 : vector<8x256xi1>, vector<8x256xf32>
    %95 = vector.shape_cast %35 : vector<1x256xf32> to vector<1x256xf32>
    %96 = vector.broadcast %95 : vector<1x256xf32> to vector<8x256xf32>
    %97 = arith.select %18, %96, %94 : vector<8x256xi1>, vector<8x256xf32>
    %98 = vector.broadcast %65 : f32 to vector<8x256xf32>
    %99 = arith.select %20, %98, %97 : vector<8x256xi1>, vector<8x256xf32>
    %100 = vector.broadcast %71 : f32 to vector<8x256xf32>
    %101 = arith.select %22, %100, %99 : vector<8x256xi1>, vector<8x256xf32>
    %c0_21 = arith.constant 0 : index
    %c0_22 = arith.constant 0 : index
    %c0_23 = arith.constant 0 : index
    %102 = vector.load %arg2[%c0_21, %c0_22, %c0_23] : memref<1x8x256xf32, #tpu.memory_space<vmem>>, vector<1x8x256xf32>
    %103 = vector.shape_cast %102 : vector<1x8x256xf32> to vector<8x256xf32>
    %104 = vector.shape_cast %101 : vector<8x256xf32> to vector<1x8x256xf32>
    tpu.vector_store %arg2[%c0_21, %c0_22, %c0_23], %104 {strides = array<i32>} : memref<1x8x256xf32, #tpu.memory_space<vmem>>, vector<1x8x256xf32>,
    return
  }
  func.func @transform_0(%arg0: i32) -> (i32, i32, i32) {
    %c0_i32 = arith.constant 0 : i32
    %c0_i32_0 = arith.constant 0 : i32
    %c0_i32_1 = arith.constant 0 : i32
    return %arg0, %c0_i32, %c0_i32_0 : i32, i32, i32
  }
  func.func @transform_1(%arg0: i32) -> (i32, i32, i32) {
    %c0_i32 = arith.constant 0 : i32
    %c0_i32_0 = arith.constant 0 : i32
    %c0_i32_1 = arith.constant 0 : i32
    return %arg0, %c0_i32, %c0_i32_0 : i32, i32, i32
  }
  func.func @transform_2(%arg0: i32) -> (i32, i32, i32) {
    %c0_i32 = arith.constant 0 : i32
    %c0_i32_0 = arith.constant 0 : i32
    %c0_i32_1 = arith.constant 0 : i32
    return %arg0, %c0_i32, %c0_i32_0 : i32, i32, i32
  }
}

</mosaic_0001>

<bundles_post_ra>
// kernel: relative_coord_predictor.1
= control target key start
LH: loop header
LB: loop body
LE: loop exit
PB: predicated region body
PF: predicated region fallthrough
CT: control target
= control target key end

     0   :  { %8 = vsyncpa [#allocation3], 0  ;;  %s1254_s0 = inlined_call_operand.vmem [shape: f32[2,4,256], index: 0, kind: input, shape index: {}]   ;;  %s1255_s1 = inlined_call_operand.vmem [shape: f32[2,8,256], index: 1, kind: output, shape index: {0}]   ;;  %s1256_s2 = inlined_call_operand.hbm [shape: f32[2,256,256], index: 2, kind: output, shape index: {1}]  }
   0x1   :  { %10 = vsyncpa [#allocation3 + $0x1], 0  ;;  %s921_s9 = smov 0   ;;  %s923_s10 = smov 0  }
   0x2   :  { %s925_s11 = smov 0   ;;  %s927_s12 = smov 0  }
   0x3 LB: > { %s942_s13 = sadd.s32 4294967295, %s899_s12   ;;  %s758_s14 = sadd.s32 4294967294, %s899_s12   ;;  %s899_s12 = sphi %s927_s12, %s1262_s12   ;;  %s895_s11 = sphi %s925_s11, %s1261_s11   ;;  %s891_s10 = sphi %s923_s10, %s1260_s10   ;;  %s887_s9 = sphi %s921_s9, %s1259_s9  }
   0x4   : > { %s946_s15 = sadd.s32 1, %s899_s12   ;;  %s75_s16 = sadd.s32 1, %s895_s11 }
   0x5   : > { %s72_s17 = ssub.s32 %s899_s12, %s946_s15  ;;  %p85_p0 = scmp.ne.s32.totalorder %s895_s11, %s891_s10 }
   0x6   : > { %p73_p1 = scmp.eq.s32.totalorder %s72_s17, 0  ;;  %p86_p2 = scmp.eq.s32.totalorder %s942_s13, 1 }
   0x7   : > { %p91_p3 = scmp.ne.s32.totalorder %s891_s10, %s887_s9  ;;  %p92_p4 = scmp.eq.s32.totalorder %s758_s14, 1 }
   0x8   : > { %s957_s18 = scalar_select %p73_p1, %s895_s11, %s75_s16  }
   0x9   : > { %p959_p5 = por %p86_p2, %p85_p0  ;;  %p963_p6 = por %p92_p4, %p91_p3 }
   0xa   : > { %p761_p7 = scmp.ge.s32.totalorder %s899_s12, 1  ;;  %p118_p8 = scmp.lt.s32.totalorder %s899_s12, 3 }
   0xc   : > { %p119_p9 = pnand %p761_p7, %p118_p8 }
   0xd   : > { %p145_p10 = scmp.lt.s32.totalorder (!%p119_p9), %s942_s13, 1  ;;  %vm183_vm0 = vcmask (!%p119_p9), 1043456   ;;  %vm198_vm1 = vcmask (!%p119_p9), 1040384   ;;  %v901_v29 = vmov (!%p119_p9), 0.0   ;;  %v155_v36 = vlaneseq (!%p119_p9)  ;;  %s142_s30 = sand.u32 (!%p119_p9), 1, %s891_s10  }
   0xe   : > { %122 = sbr.rel (%p119_p9) target bundleno = 891 (0x37b), region = 24  ;;  %v902_v45 = vmov (!%p119_p9), 0   ;;  %s762_s3 = sshll.u32 (!%p119_p9), %s142_s30, 9 }
   0xf   : > { %v156_v37 = vand.u32 (!%p119_p9), 127, %v155_v36  ;;  %s1013_s4 = scalar_lea.vmem (!%p119_p9), [#allocation2], %s762_s3  ;;  %s776_s8 = sshll.u32 (!%p119_p9), %s942_s13, 13 }
  0x10   : > { %s671_s14 = sshll.u32 (!%p119_p9), %s1013_s4, 4  ;;  %s1187_s23 = scalar_lea.hbm (!%p119_p9), %s1256_s2, %s776_s8  ;;  %s1189_s14 = int_to_ptr.vmem [resolvable:$true] %s671_s14 }
  0x11   : > { %v157_v38 = vadd.s32 (!%p119_p9), 128, %v156_v37  ;;  %v158_v39 = vcvt.s32.f32 (!%p119_p9), %v156_v37  ;;  %s1212_s24 = scalar_lea.sflag (!%p119_p9), [#allocation3], %s142_s30 }
  0x13   : > { %v159_v40 = vcvt.s32.f32 (!%p119_p9), %v157_v38  ;;  %v160_v47 = vadd.f32 (!%p119_p9), 0.5, %v158_v39 }
  0x15   : > { %s971_s21 = scalar_select %p145_p10, %s942_s13, 1  ;;  %v161_v48 = vadd.f32 0.5, %v159_v40  ;;  %v163_v49 = vmul.f32 0.0625, %v160_v47 }
  0x17   : > { %s774_s22 = sshll.u32 %s971_s21, 3  ;;  %v164_v50 = vmul.f32 0.0625, %v161_v48  ;;  %v994_v53 = vfloor.f32 %v163_v49  ;;  %s775_s7 = sshll.u32 %s971_s21, 4 }
  0x18   : > { %s149_s25 = scalar_lea.vmem %s1254_s0, %s774_s22  ;;  %s1173_s21 = scalar_lea.vmem %s1255_s1, %s775_s7 }
  0x19   : > { %v179_v0 = vld [vmem:[%s149_s25] sm:$0xff]  ;;  %v996_v54 = vfloor.f32 %v164_v50  ;;  %v167_v56 = vmul.f32 16.0, %v994_v53  ;;  %s837_s25 = scalar_lea.vmem %s1189_s14, 8192 }
  0x1a   : > { %v181_v1 = vcombine.high %v179_v0, %v179_v0  ;;  %v184_v2 = vsel %vm183_vm0, %v179_v0, 0.0  ;;  %p838_p11 = scmp.ne.s32.totalorder %s1189_s14, %s837_s25 }
  0x1b   : > { %v185_v3 = vrot.slane %v184_v2, 4  ;;  %v168_v57 = vmul.f32 16.0, %v996_v54  ;;  %v1000_v60 = vsub.f32 %v158_v39, %v167_v56 }
  0x1c   : > { %v191_v4 = vsel %vm183_vm0, %v181_v1, 0.0  ;;  %p839_p12 = pnand %p838_p11, %p959_p5 }
  0x1d   : > { %v186_v5 = vadd.f32 %v185_v3, %v184_v2  ;;  %v192_v6 = vrot.slane %v191_v4, 4  ;;  %v1002_v61 = vsub.f32 %v159_v40, %v168_v57 }
  0x1e   : > { %p840_p13 = pneg %p839_p12 }
  0x1f   : > { %v187_v7 = vrot.slane %v186_v5, 2  ;;  %v193_v8 = vadd.f32 %v192_v6, %v191_v4 }
  0x21   : > { %v188_v9 = vadd.f32 %v187_v7, %v186_v5  ;;  %v194_v10 = vrot.slane %v193_v8, 2 }
  0x23   : > { %v189_v11 = vrot.slane %v188_v9, 1  ;;  %v195_v12 = vadd.f32 %v194_v10, %v193_v8 }
  0x25   : > { %v190_v13 = vadd.f32 %v189_v11, %v188_v9  ;;  %v196_v14 = vrot.slane %v195_v12, 1 }
  0x27   : > { %v197_v15 = vadd.f32 %v196_v14, %v195_v12  ;;  %v199_v16 = vsel %vm198_vm1, %v190_v13, 0.0  ;;  %v219_v26 = vmul.f32 0.25, %v190_v13 }
  0x29   : > { %v200_v17 = vsel %vm198_vm1, %v197_v15, 0.0  ;;  %v220_v27 = vmul.f32 0.25, %v197_v15 }
  0x2a   : > { %v201_v18 = vadd.f32 %v200_v17, %v199_v16 }
  0x2c   : > { %202 = vadd.xlane.f32.xlu0 %v201_v18 }
  0xb9   : > { %v203_v19 = vpop.xlane.xlu0 %202 }
  0xba   : > { %v204_v20 = vrot.slane %v203_v19, 4 }
  0xbc   : > { %v205_v21 = vadd.f32 %v204_v20, %v203_v19 }
  0xbe   : > { %v206_v22 = vrot.slane %v205_v21, 2 }
  0xc0   : > { %v207_v23 = vadd.f32 %v206_v22, %v205_v21 }
  0xc2   : > { %v208_v24 = vrot.slane %v207_v23, 1 }
  0xc4   : > { %v209_v25 = vadd.f32 %v208_v24, %v207_v23 }
  0xc6   : > { %777 = vpush %v209_v25 }
  0xf7   : > { %s778_s26 = spop %777 }
  0xf8   : > { %s211_s27 = smul.f32 0.00390625, %s778_s26  ;;  %s903_s26 = smov [#allocation2]  }
  0xfa   : > { %v212_v28 = vstv %s211_s27  ;;  %s841_s27 = sshll.u32 %s903_s26, 4  ;;  %s842_s27 = int_to_ptr.vmem [resolvable:$false] %s841_s27 }
  0xfb   : > { %vm213_vm2 = vcmp.gt.f32.partialorder %v190_v13, %v212_v28  ;;  %vm214_vm3 = vcmp.gt.f32.partialorder %v197_v15, %v212_v28  ;;  %p844_p0 = scmp.lt.s32.totalorder %s1189_s14, %s842_s27 }
  0xfc   : > { %v977_v30 = vsel %vm213_vm2, 1.0, %v901_v29  ;;  %v979_v31 = vsel %vm214_vm3, 1.0, %v901_v29 }
  0xfd   : > { %v982_v32 = vmul.f32 %v977_v30, %v219_v26  ;;  %v985_v33 = vmul.f32 %v979_v31, %v220_v27 }
  0xff   : > { %v575_v34 = vmax.f32 %v982_v32, %v985_v33 }
 0x101   : > { %576 = vmax.xlane.f32.xlu0 %v575_v34 }
 0x12e   : > { %255 = vxpose.xlu0.b32.start.end [1/1] (short) %v985_v33, 128 }
 0x157   : > { %830 = vset.pattern.permute.xlu0 %v902_v45 }
 0x18e   : > { %v577_v35 = vpop.xlane.xlu0 %576 }
 0x18f   : > { %779 = vpush %v577_v35 }
 0x1ae   : > { %v271_v52 = vpop.trf.xlu0 }
 0x1b2   : > { %v272_v59 = vpop.trf.xlu0 }
 0x1b6   : > { %v273_v0 = vpop.trf.xlu0 }
 0x1ba   : > { %v274_v9 = vpop.trf.xlu0 }
 0x1be   : > { %v275_v11 = vpop.trf.xlu0 }
 0x1c0   : > { %s780_s28 = spop %779 }
 0x1c1   : > { %v579_v41 = vstv %s780_s28  ;;  %s843_s28 = scalar_lea.vmem %s842_s27, 16384 }
 0x1c2   : > { %vm580_vm4 = vcmp.eq.f32.partialorder %v982_v32, %v579_v41  ;;  %vm581_vm5 = vcmp.eq.f32.partialorder %v985_v33, %v579_v41  ;;  %v276_v14 = vpop.trf.xlu0  ;;  %p845_p1 = scmp.lt.s32.totalorder %s843_s28, %s837_s25 }
 0x1c3   : > { %v582_v42 = vsel %vm580_vm4, %v158_v39, 256.0  ;;  %v583_v43 = vsel %vm581_vm5, %v159_v40, 256.0 }
 0x1c4   : > { %v584_v44 = vmin.f32 %v582_v42, %v583_v43  ;;  %p846_p2 = por %p845_p1, %p844_p0 }
 0x1c6   : > { %585 = vmin.xlane.f32.xlu1 %v584_v44  ;;  %v277_v16 = vpop.trf.xlu0  ;;  %p847_p3 = pnand %p846_p2, %p840_p13 }
 0x1ca   : > { %v278_v19 = vpop.trf.xlu0 }
 0x1ce   : > { %v279_v21 = vpop.trf.xlu0 }
 0x1d2   : > { %v280_v24 = vpop.trf.xlu0 }
 0x1d6   : > { %v281_v25 = vpop.trf.xlu0 }
 0x1da   : > { %v282_v26 = vpop.trf.xlu0 }
 0x1de   : > { %v283_v27 = vpop.trf.xlu0 }
 0x1e2   : > { %v284_v29 = vpop.trf.xlu0 }
 0x1e6   : > { %v285_v34 = vpop.trf.xlu0 }
 0x1ea   : > { %v286_v35 = vpop.trf.xlu0 }
 0x1f9   : > { %223 = vxpose.xlu1.b32.start.end [1/1] (short) %v982_v32, 128 }
 0x217   : > { %831 = vset.pattern.permute.xlu1 %v902_v45 }
 0x253   : > { %v586_v46 = vpop.xlane.xlu1 %585 }
 0x254   : > { %781 = vpush %v586_v46 }
 0x279   : > { %v239_v51 = vpop.trf.xlu1 }
 0x27d   : > { %v240_v55 = vpop.trf.xlu1 }
 0x281   : > { %v241_v58 = vpop.trf.xlu1 }
 0x285   : > { %s782_s29 = spop %781  ;;  %v242_v62 = vpop.trf.xlu1 }
 0x286   : > { %v588_v63 = vstv %s782_s29 }
 0x287   : > { %vm589_vm6 = vcmp.eq.f32.partialorder %v158_v39, %v588_v63  ;;  %vm590_vm7 = vcmp.eq.f32.partialorder %v159_v40, %v588_v63 }
 0x288   : > { %v597_v1 = vsel %vm589_vm6, %v1000_v60, 256.0  ;;  %v598_v2 = vsel %vm590_vm7, %v1002_v61, 256.0  ;;  %v591_v3 = vsel %vm589_vm6, %v994_v53, 256.0  ;;  %v592_v4 = vsel %vm590_vm7, %v996_v54, 256.0 }
 0x289   : > { %v243_v5 = vpop.trf.xlu1  ;;  %v599_v6 = vmin.f32 %v597_v1, %v598_v2  ;;  %v593_v7 = vmin.f32 %v591_v3, %v592_v4 }
 0x28b   : > { %600 = vmin.xlane.f32.xlu0 %v599_v6  ;;  %594 = vmin.xlane.f32.xlu1 %v593_v7 }
 0x28d   : > { %v244_v8 = vpop.trf.xlu1 }
 0x291   : > { %v245_v10 = vpop.trf.xlu1 }
 0x295   : > { %v246_v12 = vpop.trf.xlu1 }
 0x299   : > { %v247_v13 = vpop.trf.xlu1 }
 0x29c   : > { %294 = vperm.xlu1 %831, %v240_v55  }
 0x29d   : > { %v248_v15 = vpop.trf.xlu1 }
 0x2a0   : > { %299 = vperm.xlu1 %831, %v241_v58  }
 0x2a1   : > { %289 = vperm.xlu0 %830, %v239_v51   ;;  %v249_v17 = vpop.trf.xlu1 }
 0x2a4   : > { %304 = vperm.xlu1 %831, %v242_v62  }
 0x2a5   : > { %319 = vperm.xlu0 %830, %v245_v10   ;;  %v250_v18 = vpop.trf.xlu1 }
 0x2a8   : > { %309 = vperm.xlu1 %831, %v243_v5  }
 0x2a9   : > { %v251_v20 = vpop.trf.xlu1 }
 0x2aa   : > { %349 = vperm.xlu0 %830, %v251_v20  }
 0x2ac   : > { %314 = vperm.xlu1 %831, %v244_v8  }
 0x2ad   : > { %v252_v22 = vpop.trf.xlu1 }
 0x2b0   : > { %324 = vperm.xlu1 %831, %v246_v12  }
 0x2b1   : > { %v253_v23 = vpop.trf.xlu1 }
 0x2b2   : > { %359 = vperm.xlu0 %830, %v253_v23  }
 0x2b4   : > { %329 = vperm.xlu1 %831, %v247_v13  }
 0x2b5   : > { %v254_v28 = vpop.trf.xlu1 }
 0x2b6   : > { %369 = vperm.xlu0 %830, %v271_v52  }
 0x2b8   : > { %334 = vperm.xlu1 %831, %v248_v15  }
 0x2ba   : > { %379 = vperm.xlu0 %830, %v273_v0  }
 0x2bc   : > { %339 = vperm.xlu1 %831, %v249_v17  }
 0x2be   : > { %389 = vperm.xlu0 %830, %v275_v11  }
 0x2c0   : > { %344 = vperm.xlu1 %831, %v250_v18  }
 0x2c2   : > { %399 = vperm.xlu0 %830, %v277_v16  }
 0x2c4   : > { %354 = vperm.xlu1 %831, %v252_v22  }
 0x2c6   : > { %409 = vperm.xlu0 %830, %v279_v21  }
 0x2c8   : > { %364 = vperm.xlu1 %831, %v254_v28  }
 0x2ca   : > { %419 = vperm.xlu0 %830, %v281_v25  }
 0x2cc   : > { %374 = vperm.xlu1 %831, %v272_v59  }
 0x2ce   : > { %429 = vperm.xlu0 %830, %v283_v27  }
 0x2d0   : > { %384 = vperm.xlu1 %831, %v274_v9  }
 0x2d2   : > { %439 = vperm.xlu0 %830, %v285_v34  }
 0x2d4   : > { %394 = vperm.xlu1 %831, %v276_v14  }
 0x2d8   : > { %404 = vperm.xlu1 %831, %v278_v19  }
 0x2dc   : > { %414 = vperm.xlu1 %831, %v280_v24  }
 0x2e0   : > { %424 = vperm.xlu1 %831, %v282_v26  }
 0x2e4   : > { %434 = vperm.xlu1 %831, %v284_v29  }
 0x2e8   : > { %444 = vperm.xlu1 %831, %v286_v35  }
 0x318   : > { %v595_v37 = vpop.xlane.xlu1 %594  ;;  %v601_v38 = vpop.xlane.xlu0 %600 }
 0x319   : > { %783 = vpush %v595_v37 }
 0x31a   : > { %785 = vpush %v601_v38 }
 0x31c   : > { %v295_v39 = vpop.permute.xlu1 %294 }
 0x31d   : > { %v449_v40 = vmul.f32 %v295_v39, %v982_v32  ;;  %v450_v41 = vmul.f32 %v295_v39, %v985_v33 }
 0x31f   : > { %513 = vst [vmem:[%s1013_s4 + $0x10] sm:$0xff] %v449_v40  ;;  %514 = vst [vmem:[%s1013_s4 + $0x18] sm:$0xff] %v450_v41 }
 0x320   : > { %v300_v42 = vpop.permute.xlu1 %299  ;;  %v290_v43 = vpop.permute.xlu0 %289 }
 0x321   : > { %v451_v44 = vmul.f32 %v300_v42, %v982_v32  ;;  %v452_v45 = vmul.f32 %v300_v42, %v985_v33  ;;  %v447_v46 = vmul.f32 %v290_v43, %v982_v32  ;;  %v448_v47 = vmul.f32 %v290_v43, %v985_v33 }
 0x323   : > { %515 = vst [vmem:[%s1013_s4 + $0x20] sm:$0xff] %v451_v44  ;;  %516 = vst [vmem:[%s1013_s4 + $0x28] sm:$0xff] %v452_v45 }
 0x324   : > { %511 = vst [vmem:[%s1013_s4] sm:$0xff] %v447_v46  ;;  %512 = vst [vmem:[%s1013_s4 + $0x8] sm:$0xff] %v448_v47  ;;  %v305_v48 = vpop.permute.xlu1 %304  ;;  %v320_v49 = vpop.permute.xlu0 %319 }
 0x325   : > { %v453_v50 = vmul.f32 %v305_v48, %v982_v32  ;;  %v454_v51 = vmul.f32 %v305_v48, %v985_v33  ;;  %v459_v52 = vmul.f32 %v320_v49, %v982_v32  ;;  %v460_v55 = vmul.f32 %v320_v49, %v985_v33 }
 0x327   : > { %517 = vst [vmem:[%s1013_s4 + $0x30] sm:$0xff] %v453_v50  ;;  %518 = vst [vmem:[%s1013_s4 + $0x38] sm:$0xff] %v454_v51 }
 0x328   : > { %523 = vst [vmem:[%s1013_s4 + $0x60] sm:$0xff] %v459_v52  ;;  %524 = vst [vmem:[%s1013_s4 + $0x68] sm:$0xff] %v460_v55  ;;  %v310_v56 = vpop.permute.xlu1 %309 }
 0x329   : > { %v455_v57 = vmul.f32 %v310_v56, %v982_v32  ;;  %v456_v58 = vmul.f32 %v310_v56, %v985_v33  ;;  %v350_v59 = vpop.permute.xlu0 %349 }
 0x32a   : > { %v471_v62 = vmul.f32 %v350_v59, %v982_v32  ;;  %v472_v63 = vmul.f32 %v350_v59, %v985_v33 }
 0x32b   : > { %519 = vst [vmem:[%s1013_s4 + $0x40] sm:$0xff] %v455_v57  ;;  %520 = vst [vmem:[%s1013_s4 + $0x48] sm:$0xff] %v456_v58 }
 0x32c   : > { %535 = vst [vmem:[%s1013_s4 + $0xc0] sm:$0xff] %v471_v62  ;;  %536 = vst [vmem:[%s1013_s4 + $0xc8] sm:$0xff] %v472_v63  ;;  %v315_v0 = vpop.permute.xlu1 %314 }
 0x32d   : > { %v457_v1 = vmul.f32 %v315_v0, %v982_v32  ;;  %v458_v2 = vmul.f32 %v315_v0, %v985_v33 }
 0x32f   : > { %521 = vst [vmem:[%s1013_s4 + $0x50] sm:$0xff] %v457_v1  ;;  %522 = vst [vmem:[%s1013_s4 + $0x58] sm:$0xff] %v458_v2 }
 0x330   : > { %v325_v3 = vpop.permute.xlu1 %324 }
 0x331   : > { %v461_v4 = vmul.f32 %v325_v3, %v982_v32  ;;  %v462_v5 = vmul.f32 %v325_v3, %v985_v33  ;;  %v360_v6 = vpop.permute.xlu0 %359 }
 0x332   : > { %v475_v7 = vmul.f32 %v360_v6, %v982_v32  ;;  %v476_v8 = vmul.f32 %v360_v6, %v985_v33 }
 0x333   : > { %525 = vst [vmem:[%s1013_s4 + $0x70] sm:$0xff] %v461_v4  ;;  %526 = vst [vmem:[%s1013_s4 + $0x78] sm:$0xff] %v462_v5 }
 0x334   : > { %539 = vst [vmem:[%s1013_s4 + $0xe0] sm:$0xff] %v475_v7  ;;  %540 = vst [vmem:[%s1013_s4 + $0xe8] sm:$0xff] %v476_v8  ;;  %v330_v9 = vpop.permute.xlu1 %329 }
 0x335   : > { %v463_v10 = vmul.f32 %v330_v9, %v982_v32  ;;  %v464_v11 = vmul.f32 %v330_v9, %v985_v33  ;;  %v370_v12 = vpop.permute.xlu0 %369 }
 0x336   : > { %v479_v13 = vmul.f32 %v370_v12, %v982_v32  ;;  %v480_v14 = vmul.f32 %v370_v12, %v985_v33 }
 0x337   : > { %527 = vst [vmem:[%s1013_s4 + $0x80] sm:$0xff] %v463_v10  ;;  %528 = vst [vmem:[%s1013_s4 + $0x88] sm:$0xff] %v464_v11 }
 0x338   : > { %543 = vst [vmem:[%s1013_s4 + $0x100] sm:$0xff] %v479_v13  ;;  %544 = vst [vmem:[%s1013_s4 + $0x108] sm:$0xff] %v480_v14  ;;  %v335_v15 = vpop.permute.xlu1 %334 }
 0x339   : > { %v465_v16 = vmul.f32 %v335_v15, %v982_v32  ;;  %v466_v17 = vmul.f32 %v335_v15, %v985_v33  ;;  %v380_v18 = vpop.permute.xlu0 %379 }
 0x33a   : > { %v483_v19 = vmul.f32 %v380_v18, %v982_v32  ;;  %v484_v20 = vmul.f32 %v380_v18, %v985_v33 }
 0x33b   : > { %529 = vst [vmem:[%s1013_s4 + $0x90] sm:$0xff] %v465_v16  ;;  %530 = vst [vmem:[%s1013_s4 + $0x98] sm:$0xff] %v466_v17 }
 0x33c   : > { %547 = vst [vmem:[%s1013_s4 + $0x120] sm:$0xff] %v483_v19  ;;  %548 = vst [vmem:[%s1013_s4 + $0x128] sm:$0xff] %v484_v20  ;;  %v340_v21 = vpop.permute.xlu1 %339 }
 0x33d   : > { %v467_v22 = vmul.f32 %v340_v21, %v982_v32  ;;  %v468_v23 = vmul.f32 %v340_v21, %v985_v33  ;;  %v390_v24 = vpop.permute.xlu0 %389 }
 0x33e   : > { %v487_v25 = vmul.f32 %v390_v24, %v982_v32  ;;  %v488_v26 = vmul.f32 %v390_v24, %v985_v33  ;;  %v172_v24 = vshrl.u32 %v155_v36, 7 }
 0x33f   : > { %531 = vst [vmem:[%s1013_s4 + $0xa0] sm:$0xff] %v467_v22  ;;  %532 = vst [vmem:[%s1013_s4 + $0xa8] sm:$0xff] %v468_v23 }
 0x340   : > { %551 = vst [vmem:[%s1013_s4 + $0x140] sm:$0xff] %v487_v25  ;;  %552 = vst [vmem:[%s1013_s4 + $0x148] sm:$0xff] %v488_v26  ;;  %v345_v27 = vpop.permute.xlu1 %344  ;;  %vm173_vm11 = vcmp.eq.s32.totalorder %v172_v24, 0  ;;  %vm174_vm13 = vcmp.eq.s32.totalorder %v172_v24, 1  ;;  %vm175_vm14 = vcmp.eq.s32.totalorder %v172_v24, 2  ;;  %vm176_vm15 = vcmp.eq.s32.totalorder %v172_v24, 3 }
 0x341   : > { %v469_v28 = vmul.f32 %v345_v27, %v982_v32  ;;  %v470_v29 = vmul.f32 %v345_v27, %v985_v33  ;;  %v400_v34 = vpop.permute.xlu0 %399  ;;  %vm177_vm0 = vcmp.eq.s32.totalorder %v172_v24, 4  ;;  %vm178_vm1 = vcmp.eq.s32.totalorder %v172_v24, 5 }
 0x342   : > { %v491_v35 = vmul.f32 %v400_v34, %v982_v32  ;;  %v492_v37 = vmul.f32 %v400_v34, %v985_v33 }
 0x343   : > { %533 = vst [vmem:[%s1013_s4 + $0xb0] sm:$0xff] %v469_v28  ;;  %534 = vst [vmem:[%s1013_s4 + $0xb8] sm:$0xff] %v470_v29 }
 0x344   : > { %555 = vst [vmem:[%s1013_s4 + $0x160] sm:$0xff] %v491_v35  ;;  %556 = vst [vmem:[%s1013_s4 + $0x168] sm:$0xff] %v492_v37  ;;  %v355_v38 = vpop.permute.xlu1 %354 }
 0x345   : > { %v473_v39 = vmul.f32 %v355_v38, %v982_v32  ;;  %v474_v40 = vmul.f32 %v355_v38, %v985_v33  ;;  %v410_v41 = vpop.permute.xlu0 %409 }
 0x346   : > { %v495_v42 = vmul.f32 %v410_v41, %v982_v32  ;;  %v496_v43 = vmul.f32 %v410_v41, %v985_v33 }
 0x347   : > { %537 = vst [vmem:[%s1013_s4 + $0xd0] sm:$0xff] %v473_v39  ;;  %538 = vst [vmem:[%s1013_s4 + $0xd8] sm:$0xff] %v474_v40 }
 0x348   : > { %559 = vst [vmem:[%s1013_s4 + $0x180] sm:$0xff] %v495_v42  ;;  %560 = vst [vmem:[%s1013_s4 + $0x188] sm:$0xff] %v496_v43  ;;  %v365_v44 = vpop.permute.xlu1 %364 }
 0x349   : > { %v477_v45 = vmul.f32 %v365_v44, %v982_v32  ;;  %v478_v46 = vmul.f32 %v365_v44, %v985_v33  ;;  %v420_v47 = vpop.permute.xlu0 %419 }
 0x34a   : > { %v499_v48 = vmul.f32 %v420_v47, %v982_v32  ;;  %v500_v49 = vmul.f32 %v420_v47, %v985_v33  ;;  %s784_s5 = spop %783 }
 0x34b   : > { %541 = vst [vmem:[%s1013_s4 + $0xf0] sm:$0xff] %v477_v45  ;;  %542 = vst [vmem:[%s1013_s4 + $0xf8] sm:$0xff] %v478_v46  ;;  %v1099_v50 = vstv %s784_s5  ;;  %s786_s6 = spop %785 }
 0x34c   : > { %563 = vst [vmem:[%s1013_s4 + $0x1a0] sm:$0xff] %v499_v48  ;;  %564 = vst [vmem:[%s1013_s4 + $0x1a8] sm:$0xff] %v500_v49  ;;  %v604_v51 = vsub.f32 %v994_v53, %v1099_v50  ;;  %v605_v52 = vsub.f32 %v996_v54, %v1099_v50  ;;  %v1107_v55 = vstv %s786_s6  ;;  %v375_v56 = vpop.permute.xlu1 %374 }
 0x34d   : > { %v609_v57 = vsub.f32 %v1000_v60, %v1107_v55  ;;  %v610_v58 = vsub.f32 %v1002_v61, %v1107_v55  ;;  %v481_v59 = vmul.f32 %v375_v56, %v982_v32  ;;  %v482_v62 = vmul.f32 %v375_v56, %v985_v33  ;;  %v430_v53 = vpop.permute.xlu0 %429 }
 0x34e   : > { %v1115_v63 = vmul.f32 0.0625, %v604_v51  ;;  %v1117_v0 = vmul.f32 0.0625, %v605_v52  ;;  %v503_v54 = vmul.f32 %v430_v53, %v982_v32  ;;  %v504_v1 = vmul.f32 %v430_v53, %v985_v33 }
 0x34f   : > { %v1121_v2 = vmul.f32 0.0625, %v609_v57  ;;  %v1123_v60 = vmul.f32 0.0625, %v610_v58  ;;  %545 = vst [vmem:[%s1013_s4 + $0x110] sm:$0xff] %v481_v59  ;;  %546 = vst [vmem:[%s1013_s4 + $0x118] sm:$0xff] %v482_v62 }
 0x350   : > { %v613_v61 = vmul.f32 %v1115_v63, %v1115_v63  ;;  %v614_v3 = vmul.f32 %v1117_v0, %v1117_v0  ;;  %567 = vst [vmem:[%s1013_s4 + $0x1c0] sm:$0xff] %v503_v54  ;;  %568 = vst [vmem:[%s1013_s4 + $0x1c8] sm:$0xff] %v504_v1  ;;  %v385_v4 = vpop.permute.xlu1 %384 }
 0x351   : > { %v615_v5 = vmul.f32 %v1121_v2, %v1121_v2  ;;  %v616_v6 = vmul.f32 %v1123_v60, %v1123_v60  ;;  %v485_v7 = vmul.f32 %v385_v4, %v982_v32  ;;  %v486_v8 = vmul.f32 %v385_v4, %v985_v33  ;;  %v440_v9 = vpop.permute.xlu0 %439 }
 0x352   : > { %v507_v10 = vmul.f32 %v440_v9, %v982_v32  ;;  %v508_v11 = vmul.f32 %v440_v9, %v985_v33 }
 0x353   : > { %v617_v12 = vadd.f32 %v615_v5, %v613_v61  ;;  %v618_v13 = vadd.f32 %v616_v6, %v614_v3  ;;  %549 = vst [vmem:[%s1013_s4 + $0x130] sm:$0xff] %v485_v7  ;;  %550 = vst [vmem:[%s1013_s4 + $0x138] sm:$0xff] %v486_v8 }
 0x354   : > { %571 = vst [vmem:[%s1013_s4 + $0x1e0] sm:$0xff] %v507_v10  ;;  %572 = vst [vmem:[%s1013_s4 + $0x1e8] sm:$0xff] %v508_v11  ;;  %v395_v14 = vpop.permute.xlu1 %394 }
 0x355   : > { %833 = vrsqrt.f32 %v617_v12  ;;  %v489_v15 = vmul.f32 %v395_v14, %v982_v32  ;;  %v490_v16 = vmul.f32 %v395_v14, %v985_v33  ;;  %vm621_vm8 = vcmp.eq.f32.partialorder %v617_v12, inf }
 0x356   : > { %835 = vrsqrt.f32 %v618_v13  ;;  %v624_v28 = vand.u32 2147483648, %v617_v12  ;;  %vm623_vm9 = vcmp.eq.f32.partialorder %v617_v12, 0.0  ;;  %vm628_vm10 = vcmp.eq.f32.partialorder %v618_v13, inf }
 0x357   : > { %553 = vst [vmem:[%s1013_s4 + $0x150] sm:$0xff] %v489_v15  ;;  %554 = vst [vmem:[%s1013_s4 + $0x158] sm:$0xff] %v490_v16  ;;  %v631_v38 = vand.u32 2147483648, %v618_v13  ;;  %vm630_vm12 = vcmp.eq.f32.partialorder %v618_v13, 0.0 }
 0x358   : > { %v405_v17 = vpop.permute.xlu1 %404 }
 0x359   : > { %v493_v18 = vmul.f32 %v405_v17, %v982_v32  ;;  %v494_v19 = vmul.f32 %v405_v17, %v985_v33 }
 0x35b   : > { %557 = vst [vmem:[%s1013_s4 + $0x170] sm:$0xff] %v493_v18  ;;  %558 = vst [vmem:[%s1013_s4 + $0x178] sm:$0xff] %v494_v19 }
 0x35c   : > { %v415_v20 = vpop.permute.xlu1 %414 }
 0x35d   : > { %v497_v21 = vmul.f32 %v415_v20, %v982_v32  ;;  %v498_v22 = vmul.f32 %v415_v20, %v985_v33 }
 0x35f   : > { %v834_v23 = vpop.eup %833  ;;  %561 = vst [vmem:[%s1013_s4 + $0x190] sm:$0xff] %v497_v21  ;;  %562 = vst [vmem:[%s1013_s4 + $0x198] sm:$0xff] %v498_v22 }
 0x360   : > { %v836_v25 = vpop.eup %835  ;;  %v620_v26 = vmul.f32 %v834_v23, %v617_v12  ;;  %v425_v27 = vpop.permute.xlu1 %424 }
 0x361   : > { %v627_v29 = vmul.f32 %v836_v25, %v618_v13  ;;  %v501_v34 = vmul.f32 %v425_v27, %v982_v32  ;;  %v502_v35 = vmul.f32 %v425_v27, %v985_v33 }
 0x362   : > { %v622_v37 = vsel %vm621_vm8, %v617_v12, %v620_v26 }
 0x363   : > { %v625_v36 = vsel %vm623_vm9, %v624_v28, %v622_v37  ;;  %v629_v39 = vsel %vm628_vm10, %v618_v13, %v627_v29  ;;  %565 = vst [vmem:[%s1013_s4 + $0x1b0] sm:$0xff] %v501_v34  ;;  %566 = vst [vmem:[%s1013_s4 + $0x1b8] sm:$0xff] %v502_v35 }
 0x364   : > { %v632_v40 = vsel %vm630_vm12, %v631_v38, %v629_v39  ;;  %v633_v41 = vmul.f32 %v977_v30, %v625_v36  ;;  %v435_v42 = vpop.permute.xlu1 %434 }
 0x365   : > { %v634_v43 = vmul.f32 %v979_v31, %v632_v40  ;;  %v505_v44 = vmul.f32 %v435_v42, %v982_v32  ;;  %v506_v45 = vmul.f32 %v435_v42, %v985_v33 }
 0x366   : > { %v635_v46 = vsel %vm173_vm11, %v633_v41, 0.0 }
 0x367   : > { %v636_v47 = vsel %vm173_vm11, %v634_v43, 0.0  ;;  %v637_v48 = vsel %vm174_vm13, %v1115_v63, %v635_v46  ;;  %569 = vst [vmem:[%s1013_s4 + $0x1d0] sm:$0xff] %v505_v44  ;;  %570 = vst [vmem:[%s1013_s4 + $0x1d8] sm:$0xff] %v506_v45 }
 0x368   : > { %v638_v49 = vsel %vm174_vm13, %v1117_v0, %v636_v47  ;;  %v639_v51 = vsel %vm175_vm14, %v1121_v2, %v637_v48  ;;  %v445_v52 = vpop.permute.xlu1 %444 }
 0x369   : > { %v640_v56 = vsel %vm175_vm14, %v1123_v60, %v638_v49  ;;  %v641_v57 = vsel %vm176_vm15, %v977_v30, %v639_v51  ;;  %v509_v58 = vmul.f32 %v445_v52, %v982_v32  ;;  %v510_v59 = vmul.f32 %v445_v52, %v985_v33 }
 0x36a   : > { %v642_v62 = vsel %vm176_vm15, %v979_v31, %v640_v56  ;;  %v643_v53 = vsel %vm177_vm0, %v1099_v50, %v641_v57 }
 0x36b   : > { %v644_v63 = vsel %vm177_vm0, %v1099_v50, %v642_v62  ;;  %v645_v0 = vsel %vm178_vm1, %v1107_v55, %v643_v53  ;;  %573 = vst [vmem:[%s1013_s4 + $0x1f0] sm:$0xff] %v509_v58  ;;  %574 = vst [vmem:[%s1013_s4 + $0x1f8] sm:$0xff] %v510_v59 }
 0x36c   : > { %v646_v30 = vsel %vm178_vm1, %v1107_v55, %v644_v63  ;;  %647 = vst [vmem:[%s1173_s21] sm:$0xff] %v645_v0 }
 0x36d   : > { %850 = shalt.err (!%p847_p3)
}
 0x36e   : > { %s851_s29 = scalar_lea.hbm %s1187_s23, 8192  ;;  %s855_s4 = scalar_lea.hbm %s1256_s2, 16384 }
 0x36f   : > { %p852_p4 = scmp.ne.s32.totalorder %s1187_s23, %s851_s29  ;;  %p856_p9 = scmp.lt.u32.totalorder %s1187_s23, %s1256_s2 }
 0x370   : > { %p857_p10 = scmp.lt.u32.totalorder %s855_s4, %s851_s29  ;;  %p859_p12 = scmp.lt.u32.totalorder %s851_s29, %s1187_s23 }
 0x371   : > { %p853_p7 = pnand %p852_p4, %p959_p5 }
 0x372   : > { %p858_p11 = por %p857_p10, %p856_p9 }
 0x373   : > { %p854_p8 = pneg %p853_p7 }
 0x374   : > { %p860_p13 = por %p859_p12, %p858_p11 }
 0x376   : > { %p861_p0 = pnand %p860_p13, %p854_p8 }
 0x378   : > { %864 = shalt.err (!%p861_p0)
}
 0x379   : > { %s904_s7 = smov 256   ;;  %s905_s8 = smov 16   ;;  %648 = vst [vmem:[%s1173_s21 + $0x8] sm:$0xff] %v646_v30 }
 0x37a   : > { %787 = dma.vmem_to_hbm [thread:$0]  (%p959_p5), %s1189_s14, 8192, %s1187_s23, %s1212_s24, %s904_s7, %s904_s7, %s905_s8  }
 0x37b PF: > { %p793_p1 = scmp.ge.s32.totalorder %s899_s12, 2  ;;  %s694_s16 = sand.u32 1, %s887_s9  }
 0x37c   : > { %s695_s17 = scalar_lea.sflag [#allocation3], %s694_s16 }
 0x37d   : > { %p790_p2 = pnand %p793_p1, %p963_p6 }
 0x37f   : > { %882 = dma.done.wait (!%p790_p2), %s695_s17, 8192  }
 0x380   : > { %884 = vsyncadd (!%p790_p2), %s695_s17, 4294959104  ;;  %p13_p3 = scmp.ge.s32.totalorder %s946_s15, 4   ;;  %s1259_s9 = smov %s891_s10 }
 0x381   : > { %s1260_s10 = smov %s895_s11  ;;  %s1261_s11 = smov %s957_s18 }
 0x382   : > { %s1262_s12 = smov %s946_s15  ;;  %15 = sbr.rel (!%p13_p3) target bundleno = 3 (0x3), region = 71 }
 0x389   :  { %700 = vsyncpa [#allocation3], 1 }
 0x38a   :  { %702 = vsyncpa [#allocation3 + $0x1], 1 }

</bundles_post_ra>
